<compile_context>
chip_gen: v7x
topology: tpu7x:2x2x1
jax: 0.10.0
libtpu: 0.0.40
codegen_flags: <defaults>
</compile_context>

<pallas_src>
import jax
import jax.numpy as jnp
from jax.experimental import pallas as pl
from jax.experimental.pallas import tpu as pltpu

_LANE = 128
_SUBLANE = 8
# Below this many bytes, the pallas_call launch (> ~1 us) costs more than the
# copy itself -> just return x.
_SMALL_BYTES = 256 * 1024
# ~4 MiB blocks: with double-buffered input + output (4 live buffers) we stay
# well inside the scoped-VMEM budget on v5e (16 MiB default, raised below),
# v6e (32 MiB default / 128 MiB physical) and v7x (64 MiB physical).
_TARGET_BLOCK_BYTES = 4 * 1024 * 1024
_VMEM_LIMIT_BYTES = 32 * 1024 * 1024


def _identity_kernel(x_ref, o_ref):
    # Pure pass-through: copy the current VMEM tile of x into the output tile.
    o_ref[...] = x_ref[...]


def _best_lane_width(n: int) -> int:
    """Largest lane-dense (multiple of 128) width that divides n, else 0."""
    for width in (8192, 4096, 2048, 1024, 512, 256, _LANE):
        if n % width == 0:
            return width
    return 0


def _identity_copy_2d(x2d: jax.Array) -> jax.Array:
    """Tiled Pallas HBM->HBM copy of a 2-D array (identity)."""
    rows, cols = x2d.shape
    itemsize = jnp.dtype(x2d.dtype).itemsize
    nbytes = rows * cols * itemsize

    # Rows per block: aim for ~_TARGET_BLOCK_BYTES, keep a multiple of the
    # sublane (8) when actually tiling, and prefer >= 2 grid steps so the copy
    # can shard across the two TensorCores on v7x.
    if rows <= _SUBLANE:
        tm = rows
    else:
        row_bytes = cols * itemsize
        tm = max(1, _TARGET_BLOCK_BYTES // max(1, row_bytes))
        tm = min(tm, pl.cdiv(rows, 2))          # >= 2 grid steps when possible
        tm = max(_SUBLANE, (tm // _SUBLANE) * _SUBLANE)
        tm = min(tm, rows)
    grid = (pl.cdiv(rows, tm),)

    return pl.pallas_call(
        _identity_kernel,
        out_shape=jax.ShapeDtypeStruct((rows, cols), x2d.dtype),
        grid_spec=pltpu.PrefetchScalarGridSpec(
            num_scalar_prefetch=0,
            grid=grid,
            in_specs=[pl.BlockSpec((tm, cols), lambda i: (i, 0))],
            out_specs=pl.BlockSpec((tm, cols), lambda i: (i, 0)),
        ),
        # Identity is semantically free: alias the output onto the input buffer
        # so XLA can drop the HBM round-trip when the input is donated/dead.
        input_output_aliases={0: 0},
        cost_estimate=pl.CostEstimate(
            flops=0, transcendentals=0, bytes_accessed=2 * nbytes),
        compiler_params=pltpu.CompilerParams(
            dimension_semantics=("parallel",),
            vmem_limit_bytes=_VMEM_LIMIT_BYTES,
        ),
    )(x2d)


def identity_forward(x: jax.Array, *, force_kernel: bool = False) -> jax.Array:
    """Identity.forward(x) == x.

    Tiny tensors are returned as-is (launch overhead dominates). Larger tensors
    go through a lane-dense, large-block, buffer-aliased Pallas copy.
    """
    nbytes = x.size * jnp.dtype(x.dtype).itemsize
    if not force_kernel and nbytes <= _SMALL_BYTES:
        return x  # exact; avoids pallas_call dispatch latency for tiny inputs

    orig_shape = x.shape
    n = x.size
    lane = _best_lane_width(n)
    if lane:
        # Lane-dense view: last dim a large multiple of 128 -> unmasked stores.
        x2d = x.reshape(n // lane, lane)
    elif x.ndim >= 2:
        x2d = x.reshape(-1, x.shape[-1])
    else:
        x2d = x.reshape(1, n)

    y2d = _identity_copy_2d(x2d)
    return y2d.reshape(orig_shape)


class IdentityPallas:
    """Mirror of the PyTorch Identity(MLP) module: input/hidden/output = size.

    No parameters are created by the PyTorch module, so none are created here.
    """

    def __init__(self, size: int):
        self.input_size = size
        self.hidden_size = size
        self.output_size = size

    def forward(self, x):
        return identity_forward(x)

    def encode(self, x):
        return identity_forward(x)


if __name__ == "__main__":
    key = jax.random.PRNGKey(0)

    # Small demo shapes consistent with Identity(size=32).
    batch, size = 8, 32
    model = IdentityPallas(size)
    x_small = jax.random.normal(key, (batch, size), dtype=jnp.float32)
    y_small = jax.block_until_ready(model.forward(x_small))
    assert y_small.shape == x_small.shape and y_small.dtype == x_small.dtype
    assert bool(jnp.all(y_small == x_small))

    # Explicitly exercise the Pallas copy kernel on the same small input.
    y_forced = jax.block_until_ready(identity_forward(x_small, force_kernel=True))
    assert y_forced.shape == x_small.shape and y_forced.dtype == x_small.dtype
    assert bool(jnp.all(y_forced == x_small))

    # A larger (still small: 512 KiB) input that takes the kernel path by size:
    # lane-dense 8192-wide blocks, >=2 grid steps, aliased output.
    x_big = jax.random.normal(key, (512, 256), dtype=jnp.float32)
    y_big = jax.block_until_ready(identity_forward(x_big))
    assert y_big.shape == x_big.shape and y_big.dtype == x_big.dtype
    assert bool(jnp.all(y_big == x_big))

    print("KERNEL_OK")
</pallas_src>

<mosaic_0001>
module attributes {stable_mosaic.version = 11 : i64} {
  func.func @_identity_kernel(%arg0: i32, %arg1: memref<1x256xf32, #tpu.memory_space<vmem>>, %arg2: memref<1x256xf32, #tpu.memory_space<vmem>>) attributes {dimension_semantics = [#tpu.dimension_semantics<parallel>], iteration_bounds = array<i64: 1>, scalar_prefetch = 0 : i64, scratch_operands = 0 : i64, tpu.core_type = #tpu.core_type<tc>, window_params = [{transform_indices = @transform_0, window_bounds = array<i64: 1, 256>}, {transform_indices = @transform_1, window_bounds = array<i64: 1, 256>}]} {
    %c0 = arith.constant 0 : index
    %c0_0 = arith.constant 0 : index
    %0 = vector.load %arg1[%c0, %c0_0] : memref<1x256xf32, #tpu.memory_space<vmem>>, vector<1x256xf32>
    %c0_1 = arith.constant 0 : index
    %c0_2 = arith.constant 0 : index
    %1 = vector.load %arg2[%c0_1, %c0_2] : memref<1x256xf32, #tpu.memory_space<vmem>>, vector<1x256xf32>
    tpu.vector_store %arg2[%c0_1, %c0_2], %0 {strides = array<i32>} : memref<1x256xf32, #tpu.memory_space<vmem>>, vector<1x256xf32>,
    return
  }
  func.func @transform_0(%arg0: i32) -> (i32, i32) {
    %c0_i32 = arith.constant 0 : i32
    %c0_i32_0 = arith.constant 0 : i32
    return %arg0, %c0_i32 : i32, i32
  }
  func.func @transform_1(%arg0: i32) -> (i32, i32) {
    %c0_i32 = arith.constant 0 : i32
    %c0_i32_0 = arith.constant 0 : i32
    return %arg0, %c0_i32 : i32, i32
  }
}

</mosaic_0001>

<bundles_post_ra>
// kernel: tpu_custom_call.1
= control target key start
LH: loop header
LB: loop body
LE: loop exit
PB: predicated region body
PF: predicated region fallthrough
CT: control target
= control target key end

     0   :  { %6 = vsyncpa [#allocation3], 0  ;;  %s128_s0 = inlined_call_operand.hbm [shape: f32[1,256], index: 0, kind: input, shape index: {}, may-alias: {0,1}]   ;;  %s129_s1 = inlined_call_operand.hbm [shape: f32[1,256], index: 1, kind: output, shape index: {}, may-alias: {0,1}]  }
   0x1   :  { %7 = vsyncpa [#allocation4], 0  ;;  %s92_s6 = smov [#allocation2]   ;;  %s44_s10 = scalar_lea.hbm %s128_s0, 32 }
   0x2   :  { %s14_s7 = sshll.u32 %s92_s6, 4  ;;  %p45_p0 = scmp.ne.s32.totalorder %s128_s0, %s44_s10  ;;  %s15_s7 = int_to_ptr.vmem [resolvable:$true] %s14_s7 }
   0x3   :  { %p48_p1 = scmp.lt.u32.totalorder %s44_s10, %s128_s0 }
   0x5   :  { %p50_p2 = pnand %p48_p1, %p45_p0 }
   0x7   :  { %53 = shalt.err (!%p50_p2)
}
   0x8   :  { %s54_s15 = scalar_lea.vmem %s15_s7, 32  ;;  %p59_p4 = scmp.lt.s32.totalorder %s15_s7, %s15_s7 }
   0x9   :  { %p55_p3 = scmp.ne.s32.totalorder %s15_s7, %s54_s15  ;;  %p60_p5 = scmp.lt.s32.totalorder %s54_s15, %s54_s15 }
   0xb   :  { %p61_p6 = por %p60_p5, %p59_p4 }
   0xd   :  { %p62_p7 = pnand %p61_p6, %p55_p3 }
   0xf   :  { %65 = shalt.err (!%p62_p7)
}
  0x10   :  { %17 = dma.hbm_to_vmem [thread:$0]  %s128_s0, 32, %s15_s7, [#allocation3]  }
  0x11   :  { %88 = dma.done.wait [#allocation3], 32  }
  0x12   :  { %89 = vsyncadd [#allocation3], 4294967264  ;;  %v22_v0 = vlaneseq  ;;  %s93_s18 = smov [#allocation5]   ;;  %v21_v1 = vld [vmem:[#allocation2] sm:$0x3] }
  0x13   :  { %s33_s19 = sshll.u32 %s93_s18, 4  ;;  %s34_s19 = int_to_ptr.vmem [resolvable:$true] %s33_s19 }
  0x14   :  { %vm24_vm0 = vcmp.lt.s32.totalorder %v22_v0, 256  ;;  %s66_s20 = scalar_lea.vmem %s34_s19, 32  ;;  %p71_p9 = scmp.lt.s32.totalorder %s34_s19, %s34_s19 }
  0x15   :  { %26 = vst.msk [vmem:[#allocation5] sm:$0x3] %vm24_vm0, %v21_v1  ;;  %p67_p8 = scmp.ne.s32.totalorder %s34_s19, %s66_s20  ;;  %p72_p10 = scmp.lt.s32.totalorder %s66_s20, %s66_s20 }
  0x17   :  { %p73_p11 = por %p72_p10, %p71_p9 }
  0x19   :  { %p74_p12 = pnand %p73_p11, %p67_p8 }
  0x1b   :  { %77 = shalt.err (!%p74_p12)
}
  0x1c   :  { %s78_s0 = scalar_lea.hbm %s129_s1, 32 }
  0x1d   :  { %p79_p13 = scmp.ne.s32.totalorder %s129_s1, %s78_s0  ;;  %p82_p0 = scmp.lt.u32.totalorder %s78_s0, %s129_s1 }
  0x1f   :  { %p84_p1 = pnand %p82_p0, %p79_p13 }
  0x21   :  { %87 = shalt.err (!%p84_p1)
}
  0x22   :  { %36 = dma.vmem_to_hbm [thread:$0]  %s34_s19, 32, %s129_s1, [#allocation4]  }
  0x23   :  { %90 = dma.done.wait [#allocation4], 32  }
  0x24   :  { %91 = vsyncadd [#allocation4], 4294967264 }
  0x25   :  { %40 = vsyncpa [#allocation3], 1 }
  0x26   :  { %41 = vsyncpa [#allocation4], 1 }

</bundles_post_ra>
